<compile_context>
chip_gen: v6e
topology: v6e:2x2x1
jax: 0.10.0
libtpu: 0.0.40
codegen_flags: <defaults>
</compile_context>

<pallas_src>
import jax
import jax.numpy as jnp
from jax import lax
from jax.experimental import pallas as pl
from jax.experimental.pallas import tpu as pltpu

LN_EPS = 1e-5


def _round_up(x, m):
    return ((x + m - 1) // m) * m


def _word_emb_kernel(ids_ref, table_ref, gamma_ref, beta_ref, o_ref):
    """One grid step: gather T embedding rows via one-hot MXU matmul, LayerNorm.

    ids_ref   : (T, 1)     int32     token ids for this tile
    table_ref : (vocab, E) bfloat16  full embedding table (VMEM resident)
    gamma_ref : (1, E)     float32   LayerNorm weight
    beta_ref  : (1, E)     float32   LayerNorm bias
    o_ref     : (T, E)     out dtype output tile
    """
    ids = ids_ref[...]                                        # (T, 1)
    T = ids.shape[0]
    vocab = table_ref.shape[0]

    # One-hot gather on the MXU in bf16 (0/1 are exact), f32 accumulate:
    # (T, vocab) @ (vocab, E) -> (T, E) f32.  Out-of-range ids give a zero row.
    iota = lax.broadcasted_iota(jnp.int32, (T, vocab), 1)
    onehot = (ids == iota).astype(table_ref.dtype)            # (T, vocab) bf16
    tile = jnp.dot(onehot, table_ref[...],
                   preferred_element_type=jnp.float32)        # (T, E) f32

    # LayerNorm over the last dim; all elementwise math in f32, one cast at the
    # store (v5e-friendly).
    mean = jnp.mean(tile, axis=-1, keepdims=True)
    centered = tile - mean
    var = jnp.mean(centered * centered, axis=-1, keepdims=True)
    inv = lax.rsqrt(var + LN_EPS)
    y = centered * inv * gamma_ref[...] + beta_ref[...]       # gamma/beta read once

    # TODO(synk): training-mode dropout omitted (identity in eval).
    o_ref[...] = y.astype(o_ref.dtype)                        # lane-dense store (E % 128 == 0)


def word_embedding_forward(src, table, gamma, beta, *,
                           tokens_per_block=512,
                           out_dtype=jnp.bfloat16,
                           table_dtype=jnp.bfloat16):
    """src: (B, S) int ids.  Returns (B, S, E) = LayerNorm(Embedding(src))."""
    B, S = src.shape
    vocab, E = table.shape
    N = B * S

    # Tile sizing: bounded by tokens_per_block, padded only to a multiple of 8
    # sublanes, split into >= 2 tiles when there is enough work (v7x two-TC).
    min_tiles = 2 if N >= 16 else 1
    num_tiles = max(pl.cdiv(N, tokens_per_block), min_tiles)
    T = _round_up(pl.cdiv(N, num_tiles), 8)
    num_tiles = pl.cdiv(N, T)
    N_pad = num_tiles * T

    ids_flat = src.reshape(N).astype(jnp.int32)
    ids_flat = jnp.pad(ids_flat, (0, N_pad - N))     # pad rows use id 0; sliced off
    ids_2d = ids_flat.reshape(N_pad, 1)

    table_c = table.astype(table_dtype)              # bf16 halves table DMA + VMEM
    gamma2 = gamma.reshape(1, E).astype(jnp.float32)
    beta2 = beta.reshape(1, E).astype(jnp.float32)

    out_bytes = jnp.dtype(out_dtype).itemsize
    tab_bytes = jnp.dtype(table_dtype).itemsize

    def run(single_buffer_consts):
        const_kw = dict(pipeline_mode=pl.Buffered(1)) if single_buffer_consts else {}
        tbuf = 1 if single_buffer_consts else 2
        # Scoped-VMEM budget: table + gamma/beta + ids/out double-buffers +
        # compute temporaries (one-hot + f32 intermediates), with headroom.
        est = (tbuf * vocab * E * tab_bytes
               + tbuf * 2 * 8 * E * 4
               + 2 * T * 128 * 4
               + 2 * T * E * out_bytes
               + T * vocab * 4 + 6 * T * E * 4)
        vmem_limit = int(min(max(2 * est + (4 << 20), 32 << 20), 48 << 20))
        return pl.pallas_call(
            _word_emb_kernel,
            out_shape=jax.ShapeDtypeStruct((N_pad, E), out_dtype),
            grid=(num_tiles,),
            in_specs=[
                pl.BlockSpec((T, 1), lambda i: (i, 0)),                 # ids tile
                pl.BlockSpec((vocab, E), lambda i: (0, 0), **const_kw),  # table
                pl.BlockSpec((1, E), lambda i: (0, 0), **const_kw),      # gamma
                pl.BlockSpec((1, E), lambda i: (0, 0), **const_kw),      # beta
            ],
            out_specs=pl.BlockSpec((T, E), lambda i: (i, 0)),
            compiler_params=pltpu.CompilerParams(
                dimension_semantics=("parallel",),                       # independent tiles
                vmem_limit_bytes=vmem_limit,
            ),
        )(ids_2d, table_c, gamma2, beta2)

    try:
        out_flat = run(single_buffer_consts=True)
    except Exception:
        # TODO(synk): pl.Buffered(1) rejected by this JAX build; fall back to
        # default double-buffering of the (small) grid-invariant operands.
        out_flat = run(single_buffer_consts=False)

    return out_flat[:N].reshape(B, S, E)


def _reference(src, table, gamma, beta):
    emb = table[src]  # (B, S, E) f32
    mean = jnp.mean(emb, axis=-1, keepdims=True)
    var = jnp.mean((emb - mean) ** 2, axis=-1, keepdims=True)
    return (emb - mean) * lax.rsqrt(var + LN_EPS) * gamma + beta


if __name__ == "__main__":
    # Small shapes consistent with the module: vocab=64, emb_size=128, batch=2, seq=8.
    vocab_size = 64
    emb_size = 128
    B, S = 2, 8

    key = jax.random.PRNGKey(0)
    k_tab, k_ids = jax.random.split(key)

    # Deterministic synthetic parameters (not a checkpoint):
    table = jax.random.normal(k_tab, (vocab_size, emb_size), dtype=jnp.float32)
    gamma = jnp.ones((emb_size,), dtype=jnp.float32)   # nn.LayerNorm default weight
    beta = jnp.zeros((emb_size,), dtype=jnp.float32)   # nn.LayerNorm default bias

    src = jax.random.randint(k_ids, (B, S), 0, vocab_size, dtype=jnp.int32)

    ref = _reference(src, table, gamma, beta)

    # Optimized path: bf16 MXU gather + bf16 output (halved HBM writeback).
    out_bf16 = jax.block_until_ready(word_embedding_forward(src, table, gamma, beta))
    assert out_bf16.shape == (B, S, emb_size)
    assert out_bf16.dtype == jnp.bfloat16
    assert jnp.allclose(out_bf16.astype(jnp.float32), ref, atol=6e-2, rtol=5e-2), \
        "bf16-output mismatch vs reference"

    # Same kernel with f32 store (still bf16 table/one-hot on the MXU).
    out_f32 = jax.block_until_ready(
        word_embedding_forward(src, table, gamma, beta, out_dtype=jnp.float32))
    assert out_f32.dtype == jnp.float32
    assert jnp.allclose(out_f32, ref, atol=5e-2, rtol=5e-2), \
        "f32-output mismatch vs reference"

    print("KERNEL_OK")
</pallas_src>

<mosaic_0001>
module attributes {stable_mosaic.version = 11 : i64} {
  func.func @_word_emb_kernel(%arg0: i32, %arg1: memref<8x1xi32, #tpu.memory_space<vmem>>, %arg2: memref<64x128xbf16, #tpu.memory_space<vmem>>, %arg3: memref<1x128xf32, #tpu.memory_space<vmem>>, %arg4: memref<1x128xf32, #tpu.memory_space<vmem>>, %arg5: memref<8x128xbf16, #tpu.memory_space<vmem>>) attributes {dimension_semantics = [#tpu.dimension_semantics<parallel>], iteration_bounds = array<i64: 2>, scalar_prefetch = 0 : i64, scratch_operands = 0 : i64, tpu.core_type = #tpu.core_type<tc>, window_params = [{transform_indices = @transform_0, window_bounds = array<i64: 8, 1>}, {pipeline_mode = #tpu.pipeline_mode<synchronous>, transform_indices = @transform_1, window_bounds = array<i64: 64, 128>}, {pipeline_mode = #tpu.pipeline_mode<synchronous>, transform_indices = @transform_2, window_bounds = array<i64: 1, 128>}, {pipeline_mode = #tpu.pipeline_mode<synchronous>, transform_indices = @transform_3, window_bounds = array<i64: 1, 128>}, {transform_indices = @transform_4, window_bounds = array<i64: 8, 128>}]} {
    %c0 = arith.constant 0 : index
    %c0_0 = arith.constant 0 : index
    %0 = vector.load %arg1[%c0, %c0_0] : memref<8x1xi32, #tpu.memory_space<vmem>>, vector<8x1xi32>
    %1 = tpu.iota {dimensions = array<i32: 1>} : vector<8x64xi32>
    %2 = vector.broadcast %0 : vector<8x1xi32> to vector<8x64xi32>
    %3 = arith.cmpi eq, %2, %1 : vector<8x64xi32>
    %4 = arith.extui %3 : vector<8x64xi1> to vector<8x64xi32>
    %5 = arith.sitofp %4 : vector<8x64xi32> to vector<8x64xf32>
    %6 = arith.truncf %5 : vector<8x64xf32> to vector<8x64xbf16>
    %c0_1 = arith.constant 0 : index
    %c0_2 = arith.constant 0 : index
    %7 = vector.load %arg2[%c0_1, %c0_2] : memref<64x128xbf16, #tpu.memory_space<vmem>>, vector<64x128xbf16>
    %cst = arith.constant dense<0.000000e+00> : vector<8x128xf32>
    %8 = tpu.matmul %6, %7, %cst {dimension_numbers = #tpu.dot_dimension_numbers<[1], [0], [0], [1], [0, 0, 1, 1], [], []>} : vector<8x64xbf16>, vector<64x128xbf16>, vector<8x128xf32> -> vector<8x128xf32>
    %cst_3 = arith.constant dense<0.000000e+00> : vector<8xf32>
    %9 = vector.multi_reduction <add>, %8, %cst_3 [1] : vector<8x128xf32> to vector<8xf32>
    %10 = vector.shape_cast %9 : vector<8xf32> to vector<8x1xf32>
    %cst_4 = arith.constant 1.280000e+02 : f32
    %11 = vector.broadcast %cst_4 : f32 to vector<8x1xf32>
    %12 = arith.divf %10, %11 : vector<8x1xf32>
    %13 = vector.broadcast %12 : vector<8x1xf32> to vector<8x128xf32>
    %14 = arith.subf %8, %13 : vector<8x128xf32>
    %15 = arith.mulf %14, %14 : vector<8x128xf32>
    %cst_5 = arith.constant dense<0.000000e+00> : vector<8xf32>
    %16 = vector.multi_reduction <add>, %15, %cst_5 [1] : vector<8x128xf32> to vector<8xf32>
    %17 = vector.shape_cast %16 : vector<8xf32> to vector<8x1xf32>
    %cst_6 = arith.constant 1.280000e+02 : f32
    %18 = vector.broadcast %cst_6 : f32 to vector<8x1xf32>
    %19 = arith.divf %17, %18 : vector<8x1xf32>
    %cst_7 = arith.constant 9.99999974E-6 : f32
    %20 = vector.broadcast %cst_7 : f32 to vector<8x1xf32>
    %21 = arith.addf %19, %20 : vector<8x1xf32>
    %22 = math.rsqrt %21 : vector<8x1xf32>
    %23 = vector.broadcast %22 : vector<8x1xf32> to vector<8x128xf32>
    %24 = arith.mulf %14, %23 : vector<8x128xf32>
    %c0_8 = arith.constant 0 : index
    %c0_9 = arith.constant 0 : index
    %25 = vector.load %arg3[%c0_8, %c0_9] : memref<1x128xf32, #tpu.memory_space<vmem>>, vector<1x128xf32>
    %26 = vector.broadcast %25 : vector<1x128xf32> to vector<8x128xf32>
    %27 = arith.mulf %24, %26 : vector<8x128xf32>
    %c0_10 = arith.constant 0 : index
    %c0_11 = arith.constant 0 : index
    %28 = vector.load %arg4[%c0_10, %c0_11] : memref<1x128xf32, #tpu.memory_space<vmem>>, vector<1x128xf32>
    %29 = vector.broadcast %28 : vector<1x128xf32> to vector<8x128xf32>
    %30 = arith.addf %27, %29 : vector<8x128xf32>
    %31 = arith.truncf %30 : vector<8x128xf32> to vector<8x128xbf16>
    %c0_12 = arith.constant 0 : index
    %c0_13 = arith.constant 0 : index
    %32 = vector.load %arg5[%c0_12, %c0_13] : memref<8x128xbf16, #tpu.memory_space<vmem>>, vector<8x128xbf16>
    tpu.vector_store %arg5[%c0_12, %c0_13], %31 {strides = array<i32>} : memref<8x128xbf16, #tpu.memory_space<vmem>>, vector<8x128xbf16>,
    return
  }
  func.func @transform_0(%arg0: i32) -> (i32, i32) {
    %c0_i32 = arith.constant 0 : i32
    %c0_i32_0 = arith.constant 0 : i32
    return %arg0, %c0_i32 : i32, i32
  }
  func.func @transform_1(%arg0: i32) -> (i32, i32) {
    %c0_i32 = arith.constant 0 : i32
    %c0_i32_0 = arith.constant 0 : i32
    %c0_i32_1 = arith.constant 0 : i32
    return %c0_i32, %c0_i32_0 : i32, i32
  }
  func.func @transform_2(%arg0: i32) -> (i32, i32) {
    %c0_i32 = arith.constant 0 : i32
    %c0_i32_0 = arith.constant 0 : i32
    %c0_i32_1 = arith.constant 0 : i32
    return %c0_i32, %c0_i32_0 : i32, i32
  }
  func.func @transform_3(%arg0: i32) -> (i32, i32) {
    %c0_i32 = arith.constant 0 : i32
    %c0_i32_0 = arith.constant 0 : i32
    %c0_i32_1 = arith.constant 0 : i32
    return %c0_i32, %c0_i32_0 : i32, i32
  }
  func.func @transform_4(%arg0: i32) -> (i32, i32) {
    %c0_i32 = arith.constant 0 : i32
    %c0_i32_0 = arith.constant 0 : i32
    return %arg0, %c0_i32 : i32, i32
  }
}

module attributes {stable_mosaic.version = 11 : i64} {
  func.func @_word_emb_kernel(%arg0: i32, %arg1: memref<8x1xi32, #tpu.memory_space<vmem>>, %arg2: memref<64x128xbf16, #tpu.memory_space<vmem>>, %arg3: memref<1x128xf32, #tpu.memory_space<vmem>>, %arg4: memref<1x128xf32, #tpu.memory_space<vmem>>, %arg5: memref<8x128xbf16, #tpu.memory_space<vmem>>) attributes {dimension_semantics = [#tpu.dimension_semantics<parallel>], iteration_bounds = array<i64: 2>, scalar_prefetch = 0 : i64, scratch_operands = 0 : i64, tpu.core_type = #tpu.core_type<tc>, window_params = [{transform_indices = @transform_0, window_bounds = array<i64: 8, 1>}, {pipeline_mode = #tpu.pipeline_mode<synchronous>, transform_indices = @transform_1, window_bounds = array<i64: 64, 128>}, {pipeline_mode = #tpu.pipeline_mode<synchronous>, transform_indices = @transform_2, window_bounds = array<i64: 1, 128>}, {pipeline_mode = #tpu.pipeline_mode<synchronous>, transform_indices = @transform_3, window_bounds = array<i64: 1, 128>}, {transform_indices = @transform_4, window_bounds = array<i64: 8, 128>}]} {
    %c0 = arith.constant 0 : index
    %c0_0 = arith.constant 0 : index
    %0 = vector.load %arg1[%c0, %c0_0] : memref<8x1xi32, #tpu.memory_space<vmem>>, vector<8x1xi32>
    %1 = tpu.iota {dimensions = array<i32: 1>} : vector<8x64xi32>
    %2 = vector.broadcast %0 : vector<8x1xi32> to vector<8x64xi32>
    %3 = arith.cmpi eq, %2, %1 : vector<8x64xi32>
    %4 = arith.extui %3 : vector<8x64xi1> to vector<8x64xi32>
    %5 = arith.sitofp %4 : vector<8x64xi32> to vector<8x64xf32>
    %6 = arith.truncf %5 : vector<8x64xf32> to vector<8x64xbf16>
    %c0_1 = arith.constant 0 : index
    %c0_2 = arith.constant 0 : index
    %7 = vector.load %arg2[%c0_1, %c0_2] : memref<64x128xbf16, #tpu.memory_space<vmem>>, vector<64x128xbf16>
    %cst = arith.constant dense<0.000000e+00> : vector<8x128xf32>
    %8 = tpu.matmul %6, %7, %cst {dimension_numbers = #tpu.dot_dimension_numbers<[1], [0], [0], [1], [0, 0, 1, 1], [], []>} : vector<8x64xbf16>, vector<64x128xbf16>, vector<8x128xf32> -> vector<8x128xf32>
    %cst_3 = arith.constant dense<0.000000e+00> : vector<8xf32>
    %9 = vector.multi_reduction <add>, %8, %cst_3 [1] : vector<8x128xf32> to vector<8xf32>
    %10 = vector.shape_cast %9 : vector<8xf32> to vector<8x1xf32>
    %cst_4 = arith.constant 1.280000e+02 : f32
    %11 = vector.broadcast %cst_4 : f32 to vector<8x1xf32>
    %12 = arith.divf %10, %11 : vector<8x1xf32>
    %13 = vector.broadcast %12 : vector<8x1xf32> to vector<8x128xf32>
    %14 = arith.subf %8, %13 : vector<8x128xf32>
    %15 = arith.mulf %14, %14 : vector<8x128xf32>
    %cst_5 = arith.constant dense<0.000000e+00> : vector<8xf32>
    %16 = vector.multi_reduction <add>, %15, %cst_5 [1] : vector<8x128xf32> to vector<8xf32>
    %17 = vector.shape_cast %16 : vector<8xf32> to vector<8x1xf32>
    %cst_6 = arith.constant 1.280000e+02 : f32
    %18 = vector.broadcast %cst_6 : f32 to vector<8x1xf32>
    %19 = arith.divf %17, %18 : vector<8x1xf32>
    %cst_7 = arith.constant 9.99999974E-6 : f32
    %20 = vector.broadcast %cst_7 : f32 to vector<8x1xf32>
    %21 = arith.addf %19, %20 : vector<8x1xf32>
    %22 = math.rsqrt %21 : vector<8x1xf32>
    %23 = vector.broadcast %22 : vector<8x1xf32> to vector<8x128xf32>
    %24 = arith.mulf %14, %23 : vector<8x128xf32>
    %c0_8 = arith.constant 0 : index
    %c0_9 = arith.constant 0 : index
    %25 = vector.load %arg3[%c0_8, %c0_9] : memref<1x128xf32, #tpu.memory_space<vmem>>, vector<1x128xf32>
    %26 = vector.broadcast %25 : vector<1x128xf32> to vector<8x128xf32>
    %27 = arith.mulf %24, %26 : vector<8x128xf32>
    %c0_10 = arith.constant 0 : index
    %c0_11 = arith.constant 0 : index
    %28 = vector.load %arg4[%c0_10, %c0_11] : memref<1x128xf32, #tpu.memory_space<vmem>>, vector<1x128xf32>
    %29 = vector.broadcast %28 : vector<1x128xf32> to vector<8x128xf32>
    %30 = arith.addf %27, %29 : vector<8x128xf32>
    %31 = arith.truncf %30 : vector<8x128xf32> to vector<8x128xbf16>
    %c0_12 = arith.constant 0 : index
    %c0_13 = arith.constant 0 : index
    %32 = vector.load %arg5[%c0_12, %c0_13] : memref<8x128xbf16, #tpu.memory_space<vmem>>, vector<8x128xbf16>
    tpu.vector_store %arg5[%c0_12, %c0_13], %31 {strides = array<i32>} : memref<8x128xbf16, #tpu.memory_space<vmem>>, vector<8x128xbf16>,
    return
  }
  func.func @transform_0(%arg0: i32) -> (i32, i32) {
    %c0_i32 = arith.constant 0 : i32
    %c0_i32_0 = arith.constant 0 : i32
    return %arg0, %c0_i32 : i32, i32
  }
  func.func @transform_1(%arg0: i32) -> (i32, i32) {
    %c0_i32 = arith.constant 0 : i32
    %c0_i32_0 = arith.constant 0 : i32
    %c0_i32_1 = arith.constant 0 : i32
    return %c0_i32, %c0_i32_0 : i32, i32
  }
  func.func @transform_2(%arg0: i32) -> (i32, i32) {
    %c0_i32 = arith.constant 0 : i32
    %c0_i32_0 = arith.constant 0 : i32
    %c0_i32_1 = arith.constant 0 : i32
    return %c0_i32, %c0_i32_0 : i32, i32
  }
  func.func @transform_3(%arg0: i32) -> (i32, i32) {
    %c0_i32 = arith.constant 0 : i32
    %c0_i32_0 = arith.constant 0 : i32
    %c0_i32_1 = arith.constant 0 : i32
    return %c0_i32, %c0_i32_0 : i32, i32
  }
  func.func @transform_4(%arg0: i32) -> (i32, i32) {
    %c0_i32 = arith.constant 0 : i32
    %c0_i32_0 = arith.constant 0 : i32
    return %arg0, %c0_i32 : i32, i32
  }
}

</mosaic_0001>

<bundles_post_ra>
// kernel: tpu_custom_call.1
= control target key start
LH: loop header
LB: loop body
LE: loop exit
PB: predicated region body
PF: predicated region fallthrough
CT: control target
= control target key end

     0   :  { %9 = vsyncpa [#allocation3], 0  ;;  %s744_s0 = inlined_call_operand.vmem [shape: s32[16,1], index: 0, kind: input, shape index: {}]   ;;  %s745_s1 = inlined_call_operand.hbm [shape: bf16[64,128], index: 1, kind: input, shape index: {}]   ;;  %s746_s2 = inlined_call_operand.vmem [shape: f32[1,128], index: 2, kind: input, shape index: {}]   ;;  %s747_s3 = inlined_call_operand.vmem [shape: f32[1,128], index: 3, kind: input, shape index: {}]   ;;  %s748_s4 = inlined_call_operand.hbm [shape: bf16[16,128], index: 4, kind: output, shape index: {}]  }
   0x1   :  { %10 = vsyncpa [#allocation4], 0 }
   0x2   :  { %12 = vsyncpa [#allocation4 + $0x1], 0  ;;  %s633_s15 = smov 0   ;;  %s635_s16 = smov 0  }
   0x3   :  { %s637_s17 = smov 0   ;;  %s639_s18 = smov 0  }
   0x4 LB: > { %s654_s19 = sadd.s32 4294967295, %s599_s18   ;;  %s410_s20 = sadd.s32 4294967294, %s599_s18   ;;  %s599_s18 = sphi %s639_s18, %s756_s18   ;;  %s595_s17 = sphi %s637_s17, %s755_s17   ;;  %s591_s16 = sphi %s635_s16, %s754_s16   ;;  %s587_s15 = sphi %s633_s15, %s753_s15  }
   0x5   : > { %s658_s21 = sadd.s32 1, %s599_s18   ;;  %s114_s22 = sadd.s32 1, %s595_s17 }
   0x6   : > { %s111_s23 = ssub.s32 %s599_s18, %s658_s21  ;;  %p124_p0 = scmp.ne.s32.totalorder %s595_s17, %s591_s16 }
   0x7   : > { %p112_p1 = scmp.eq.s32.totalorder %s111_s23, 0  ;;  %p125_p2 = scmp.eq.s32.totalorder %s654_s19, 1 }
   0x8   : > { %p130_p3 = scmp.ne.s32.totalorder %s591_s16, %s587_s15  ;;  %p131_p4 = scmp.eq.s32.totalorder %s410_s20, 1 }
   0x9   : > { %s669_s24 = scalar_select %p112_p1, %s595_s17, %s114_s22  }
   0xa   : > { %p671_p5 = por %p125_p2, %p124_p0  ;;  %p675_p6 = por %p131_p4, %p130_p3 }
   0xb   : > { %p411_p7 = scmp.ge.s32.totalorder %s599_s18, 1  ;;  %p138_p8 = scmp.lt.s32.totalorder %s599_s18, 3 }
   0xc   : > { %s750_s26 = scalar_select %p675_p6, 1, 0 }
   0xd   : > { %p461_p9 = scmp.eq.s32.totalorder %s654_s19, 0  ;;  %p682_p10 = pnand %p411_p7, %p138_p8 }
   0xe   : > { %s601_s28 = smov [#allocation2]  }
   0xf   : > { %s150_s29 = sshll.u32 %s601_s28, 4  ;;  %p453_p11 = pneg %p682_p10  ;;  %s151_s29 = int_to_ptr.vmem [resolvable:$true] %s150_s29 }
  0x10   : > { %s520_s30 = scalar_lea.vmem %s151_s29, 512  ;;  %p528_p3 = scmp.lt.s32.totalorder %s151_s29, %s151_s29 }
  0x11   : > { %p454_p12 = pnand %p461_p9, %p453_p11  ;;  %p521_p0 = scmp.ne.s32.totalorder %s151_s29, %s520_s30 }
  0x12   : > { %p529_p4 = scmp.lt.s32.totalorder %s520_s30, %s520_s30 }
  0x13   : > { %p511_p13 = pneg %p454_p12 }
  0x14   : > { %p530_p6 = por %p529_p4, %p528_p3 }
  0x15   : > { %p523_p1 = pnand %p521_p0, %p511_p13 }
  0x17   : > { %p524_p2 = pneg %p523_p1 }
  0x19   : > { %p531_p7 = pnand %p530_p6, %p524_p2 }
  0x1b   : > { %534 = shalt.err (!%p531_p7)
}
  0x1c   : > { %s602_s5 = smov 64   ;;  %s603_s6 = smov 4  }
  0x1d   : > { %456 = dma.hbm_to_vmem [thread:$0]  (!%p454_p12), %s745_s1, 512, %s151_s29, [#allocation3], %s602_s5, %s602_s5, %s603_s6  }
  0x1e   : > { %179 = sbr.rel (%p682_p10) target bundleno = 685 (0x2ad), region = 36 }
  0x23   : > { %578 = dma.done.wait (%p461_p9), [#allocation3], 512  }
  0x24   : > { %580 = vsyncadd (%p461_p9), [#allocation3], 4294966784  ;;  %p204_p8 = scmp.lt.s32.totalorder %s654_s19, 1  ;;  %v604_v0 = vmov 0   ;;  %v605_v1 = vmov 0.0   ;;  %vm606_vm0 = vmmov 0   ;;  %v210_v7 = vlaneseq }
  0x25   : > { %502 = vset.pattern.permute.xlu0 %v604_v0  ;;  %435 = vmatprep.subr.bf16.mxu0 %v605_v1  ;;  %v503_v3 = vld [vmem:[#allocation2 + $0x18] sm:$0xff]   ;;  %v504_v4 = vld [vmem:[#allocation2 + $0x10] sm:$0xff]   ;;  %v505_v5 = vld [vmem:[#allocation2 + $0x8] sm:$0xff]   ;;  %vm251_vm2 = vcmask 523264   ;;  %s201_s14 = sand.u32 1, %s591_s16   ;;  %s427_s29 = sshll.u32 %s654_s19, 6 }
  0x26   : > { %s205_s9 = scalar_select %p204_p8, %s654_s19, 1  ;;  %443 = vmatprep.mubr.msk.bf16.mxu0 %vm606_vm0, %v605_v1  ;;  %436 = vmatpush3.bf16.msra.mxu0 %v503_v3  ;;  %v506_v6 = vld [vmem:[#allocation2] sm:$0xff]   ;;  %v211_v8 = vand.u32 127, %v210_v7 }
  0x27   : > { %437 = vmatprep.subr.bf16.mxu0 %v605_v1  ;;  %s416_s20 = sshll.u32 %s201_s14, 2  ;;  %v424_v24 = vld [vmem:[%s746_s2] ss:$0 sm:$0xff]  ;;  %s337_s8 = scalar_lea.hbm %s748_s4, %s427_s29 }
  0x28   : > { %s417_s10 = sshll.u32 %s205_s9, 3  ;;  %v425_v26 = vld [vmem:[%s747_s3] ss:$0 sm:$0xff]  ;;  %s203_s30 = scalar_lea.vmem [#allocation5], %s416_s20 }
  0x29   : > { %s207_s13 = scalar_lea.vmem %s744_s0, %s417_s10  ;;  %s339_s5 = sshll.u32 %s203_s30, 4  ;;  %s340_s5 = int_to_ptr.vmem [resolvable:$true] %s339_s5 }
  0x2a   : > { %v209_v2 = vld [vmem:[%s207_s13] sm:$0xff]  ;;  %438 = vmatpush3.bf16.msra.mxu0 %v504_v4  ;;  %s326_s9 = scalar_lea.sflag [#allocation4], %s201_s14  ;;  %s535_s10 = scalar_lea.vmem %s340_s5, 64 }
  0x2b   : > { %213 = vperm.xlu0 %502, %v209_v2   ;;  %439 = vmatprep.subr.bf16.mxu0 %v605_v1  ;;  %p536_p6 = scmp.ne.s32.totalorder %s340_s5, %s535_s10  ;;  %s607_s11 = smov [#allocation5]  }
  0x2c   : > { %s539_s12 = sshll.u32 %s607_s11, 4  ;;  %s540_s12 = int_to_ptr.vmem [resolvable:$false] %s539_s12 }
  0x2d   : > { %p537_p9 = pnand %p536_p6, %p671_p5  ;;  %s541_s19 = scalar_lea.vmem %s540_s12, 128 }
  0x2e   : > { %440 = vmatpush3.bf16.msra.mxu0 %v505_v5  ;;  %p542_p11 = scmp.lt.s32.totalorder %s340_s5, %s540_s12  ;;  %p543_p12 = scmp.lt.s32.totalorder %s541_s19, %s535_s10 }
  0x2f   : > { %441 = vmatprep.subr.bf16.mxu0 %v605_v1  ;;  %p538_p10 = pneg %p537_p9 }
  0x30   : > { %p544_p13 = por %p543_p12, %p542_p11 }
  0x32   : > { %442 = vmatpush3.bf16.msra.mxu0 %v506_v6  ;;  %p545_p0 = pnand %p544_p13, %p538_p10 }
  0xa6   : > { %v214_v9 = vpop.permute.xlu0 %213 }
  0xa7   : > { %vm215_vm1 = vcmp.eq.s32.totalorder %v214_v9, %v211_v8 }
  0xa8   : > { %v418_v10 = vsel %vm215_vm1, 1.0, %v605_v1 }
  0xa9   : > { %v218_v11 = vpack.c.bf16 %v418_v10, %v418_v10 }
  0xab   : > { %444 = vmatmul.mubr.msk.bf16.vlgmr.msra.gmra.mxu0 %vm251_vm2, %v218_v11 }
 0x16b   : > { %v289_v12 = vpop.f32.mrf.mxu0 }
 0x16c   : > { %295 = vadd.xlane.f32.xlu0 %v289_v12 }
 0x16d   : > { %v445_v13 = vpop.f32.mrf.mxu0 }
 0x16f   : > { %v292_v14 = vpop.f32.mrf.mxu0 }
 0x171   : > { %v446_v15 = vpop.f32.mrf.mxu0 }
 0x1f5   : > { %v296_v16 = vpop.xlane.xlu0 %295 }
 0x1f6   : > { %v298_v17 = vmul.f32 0.0078125, %v296_v16 }
 0x1f8   : > { %v299_v18 = vsub.f32 %v289_v12, %v298_v17 }
 0x1fa   : > { %v300_v19 = vmul.f32 %v299_v18, %v299_v18 }
 0x1fc   : > { %301 = vadd.xlane.f32.xlu1 %v300_v19 }
 0x285   : > { %v302_v20 = vpop.xlane.xlu1 %301 }
 0x286   : > { %v303_v21 = vmul.f32 0.0078125, %v302_v20 }
 0x288   : > { %v304_v22 = vadd.f32 1e-05, %v303_v21 }
 0x28a   : > { %507 = vrsqrt.f32 %v304_v22 }
 0x297   : > { %v508_v23 = vpop.eup %507 }
 0x298   : > { %v306_v25 = vmul.f32 %v508_v23, %v299_v18 }
 0x29a   : > { %v314_v27 = vmul.f32 %v424_v24, %v306_v25 }
 0x29c   : > { %v322_v28 = vadd.f32 %v425_v26, %v314_v27 }
 0x29e   : > { %v323_v29 = vpack.c.bf16 %v322_v28, %v322_v28 }
 0x2a0   : > { %324 = vst [vmem:[%s203_s30] sm:$0xf] %v323_v29 }
 0x2a1   : > { %548 = shalt.err (!%p545_p0)
}
 0x2a2   : > { %s549_s13 = scalar_lea.hbm %s337_s8, 64  ;;  %s553_s22 = scalar_lea.hbm %s748_s4, 128 }
 0x2a3   : > { %p550_p1 = scmp.ne.s32.totalorder %s337_s8, %s549_s13  ;;  %p554_p4 = scmp.lt.s32.totalorder %s337_s8, %s748_s4 }
 0x2a4   : > { %p555_p7 = scmp.lt.s32.totalorder %s553_s22, %s549_s13 }
 0x2a5   : > { %p551_p2 = pnand %p550_p1, %p671_p5 }
 0x2a6   : > { %p556_p8 = por %p555_p7, %p554_p4 }
 0x2a7   : > { %p552_p3 = pneg %p551_p2 }
 0x2a9   : > { %p557_p6 = pnand %p556_p8, %p552_p3 }
 0x2ab   : > { %560 = shalt.err (!%p557_p6)
}
 0x2ac   : > { %451 = dma.vmem_to_hbm [thread:$0]  (%p671_p5), %s340_s5, 64, %s337_s8, %s326_s9  }
 0x2ad PF: > { %p463_p9 = scmp.ge.s32.totalorder %s599_s18, 2  ;;  %s351_s28 = sand.u32 1, %s587_s15  }
 0x2ae   : > { %p752_p10 = scmp.ne.s32.totalorder %s750_s26, 0  ;;  %s352_s29 = scalar_lea.sflag [#allocation4], %s351_s28 }
 0x2b0   : > { %p458_p11 = pnand %p463_p9, %p752_p10 }
 0x2b2   : > { %p459_p12 = pneg %p458_p11 }
 0x2b4   : > { %582 = dma.done.wait (%p459_p12), %s352_s29, 64  }
 0x2b5   : > { %584 = vsyncadd (%p459_p12), %s352_s29, 4294967232  ;;  %p15_p13 = scmp.ge.s32.totalorder %s658_s21, 4   ;;  %s753_s15 = smov %s591_s16 }
 0x2b6   : > { %s754_s16 = smov %s595_s17  ;;  %s755_s17 = smov %s669_s24 }
 0x2b7   : > { %s756_s18 = smov %s658_s21  ;;  %17 = sbr.rel (!%p15_p13) target bundleno = 4 (0x4), region = 76 }
 0x2bc   :  { %357 = vsyncpa [#allocation3], 1 }
 0x2bd   :  { %359 = vsyncpa [#allocation3 + $0x1], 1 }
 0x2be   :  { %360 = vsyncpa [#allocation4], 1 }
 0x2bf   :  { %362 = vsyncpa [#allocation4 + $0x1], 1 }

// kernel: tpu_custom_call.1
= control target key start
LH: loop header
LB: loop body
LE: loop exit
PB: predicated region body
PF: predicated region fallthrough
CT: control target
= control target key end

     0   :  { %9 = vsyncpa [#allocation3], 0  ;;  %s744_s0 = inlined_call_operand.vmem [shape: s32[16,1], index: 0, kind: input, shape index: {}]   ;;  %s745_s1 = inlined_call_operand.hbm [shape: bf16[64,128], index: 1, kind: input, shape index: {}]   ;;  %s746_s2 = inlined_call_operand.vmem [shape: f32[1,128], index: 2, kind: input, shape index: {}]   ;;  %s747_s3 = inlined_call_operand.vmem [shape: f32[1,128], index: 3, kind: input, shape index: {}]   ;;  %s748_s4 = inlined_call_operand.hbm [shape: bf16[16,128], index: 4, kind: output, shape index: {}]  }
   0x1   :  { %10 = vsyncpa [#allocation4], 0 }
   0x2   :  { %12 = vsyncpa [#allocation4 + $0x1], 0  ;;  %s633_s15 = smov 0   ;;  %s635_s16 = smov 0  }
   0x3   :  { %s637_s17 = smov 0   ;;  %s639_s18 = smov 0  }
   0x4 LB: > { %s654_s19 = sadd.s32 4294967295, %s599_s18   ;;  %s410_s20 = sadd.s32 4294967294, %s599_s18   ;;  %s599_s18 = sphi %s639_s18, %s756_s18   ;;  %s595_s17 = sphi %s637_s17, %s755_s17   ;;  %s591_s16 = sphi %s635_s16, %s754_s16   ;;  %s587_s15 = sphi %s633_s15, %s753_s15  }
   0x5   : > { %s658_s21 = sadd.s32 1, %s599_s18   ;;  %s114_s22 = sadd.s32 1, %s595_s17 }
   0x6   : > { %s111_s23 = ssub.s32 %s599_s18, %s658_s21  ;;  %p124_p0 = scmp.ne.s32.totalorder %s595_s17, %s591_s16 }
   0x7   : > { %p112_p1 = scmp.eq.s32.totalorder %s111_s23, 0  ;;  %p125_p2 = scmp.eq.s32.totalorder %s654_s19, 1 }
   0x8   : > { %p130_p3 = scmp.ne.s32.totalorder %s591_s16, %s587_s15  ;;  %p131_p4 = scmp.eq.s32.totalorder %s410_s20, 1 }
   0x9   : > { %s669_s24 = scalar_select %p112_p1, %s595_s17, %s114_s22  }
   0xa   : > { %p671_p5 = por %p125_p2, %p124_p0  ;;  %p675_p6 = por %p131_p4, %p130_p3 }
   0xb   : > { %p411_p7 = scmp.ge.s32.totalorder %s599_s18, 1  ;;  %p138_p8 = scmp.lt.s32.totalorder %s599_s18, 3 }
   0xc   : > { %s750_s26 = scalar_select %p675_p6, 1, 0 }
   0xd   : > { %p461_p9 = scmp.eq.s32.totalorder %s654_s19, 0  ;;  %p682_p10 = pnand %p411_p7, %p138_p8 }
   0xe   : > { %s601_s28 = smov [#allocation2]  }
   0xf   : > { %s150_s29 = sshll.u32 %s601_s28, 4  ;;  %p453_p11 = pneg %p682_p10  ;;  %s151_s29 = int_to_ptr.vmem [resolvable:$true] %s150_s29 }
  0x10   : > { %s520_s30 = scalar_lea.vmem %s151_s29, 512  ;;  %p528_p3 = scmp.lt.s32.totalorder %s151_s29, %s151_s29 }
  0x11   : > { %p454_p12 = pnand %p461_p9, %p453_p11  ;;  %p521_p0 = scmp.ne.s32.totalorder %s151_s29, %s520_s30 }
  0x12   : > { %p529_p4 = scmp.lt.s32.totalorder %s520_s30, %s520_s30 }
  0x13   : > { %p511_p13 = pneg %p454_p12 }
  0x14   : > { %p530_p6 = por %p529_p4, %p528_p3 }
  0x15   : > { %p523_p1 = pnand %p521_p0, %p511_p13 }
  0x17   : > { %p524_p2 = pneg %p523_p1 }
  0x19   : > { %p531_p7 = pnand %p530_p6, %p524_p2 }
  0x1b   : > { %534 = shalt.err (!%p531_p7)
}
  0x1c   : > { %s602_s5 = smov 64   ;;  %s603_s6 = smov 4  }
  0x1d   : > { %456 = dma.hbm_to_vmem [thread:$0]  (!%p454_p12), %s745_s1, 512, %s151_s29, [#allocation3], %s602_s5, %s602_s5, %s603_s6  }
  0x1e   : > { %179 = sbr.rel (%p682_p10) target bundleno = 685 (0x2ad), region = 36 }
  0x23   : > { %578 = dma.done.wait (%p461_p9), [#allocation3], 512  }
  0x24   : > { %580 = vsyncadd (%p461_p9), [#allocation3], 4294966784  ;;  %p204_p8 = scmp.lt.s32.totalorder %s654_s19, 1  ;;  %v604_v0 = vmov 0   ;;  %v605_v1 = vmov 0.0   ;;  %vm606_vm0 = vmmov 0   ;;  %v210_v7 = vlaneseq }
  0x25   : > { %502 = vset.pattern.permute.xlu0 %v604_v0  ;;  %435 = vmatprep.subr.bf16.mxu0 %v605_v1  ;;  %v503_v3 = vld [vmem:[#allocation2 + $0x18] sm:$0xff]   ;;  %v504_v4 = vld [vmem:[#allocation2 + $0x10] sm:$0xff]   ;;  %v505_v5 = vld [vmem:[#allocation2 + $0x8] sm:$0xff]   ;;  %vm251_vm2 = vcmask 523264   ;;  %s201_s14 = sand.u32 1, %s591_s16   ;;  %s427_s29 = sshll.u32 %s654_s19, 6 }
  0x26   : > { %s205_s9 = scalar_select %p204_p8, %s654_s19, 1  ;;  %443 = vmatprep.mubr.msk.bf16.mxu0 %vm606_vm0, %v605_v1  ;;  %436 = vmatpush3.bf16.msra.mxu0 %v503_v3  ;;  %v506_v6 = vld [vmem:[#allocation2] sm:$0xff]   ;;  %v211_v8 = vand.u32 127, %v210_v7 }
  0x27   : > { %437 = vmatprep.subr.bf16.mxu0 %v605_v1  ;;  %s416_s20 = sshll.u32 %s201_s14, 2  ;;  %v424_v24 = vld [vmem:[%s746_s2] ss:$0 sm:$0xff]  ;;  %s337_s8 = scalar_lea.hbm %s748_s4, %s427_s29 }
  0x28   : > { %s417_s10 = sshll.u32 %s205_s9, 3  ;;  %v425_v26 = vld [vmem:[%s747_s3] ss:$0 sm:$0xff]  ;;  %s203_s30 = scalar_lea.vmem [#allocation5], %s416_s20 }
  0x29   : > { %s207_s13 = scalar_lea.vmem %s744_s0, %s417_s10  ;;  %s339_s5 = sshll.u32 %s203_s30, 4  ;;  %s340_s5 = int_to_ptr.vmem [resolvable:$true] %s339_s5 }
  0x2a   : > { %v209_v2 = vld [vmem:[%s207_s13] sm:$0xff]  ;;  %438 = vmatpush3.bf16.msra.mxu0 %v504_v4  ;;  %s326_s9 = scalar_lea.sflag [#allocation4], %s201_s14  ;;  %s535_s10 = scalar_lea.vmem %s340_s5, 64 }
  0x2b   : > { %213 = vperm.xlu0 %502, %v209_v2   ;;  %439 = vmatprep.subr.bf16.mxu0 %v605_v1  ;;  %p536_p6 = scmp.ne.s32.totalorder %s340_s5, %s535_s10  ;;  %s607_s11 = smov [#allocation5]  }
  0x2c   : > { %s539_s12 = sshll.u32 %s607_s11, 4  ;;  %s540_s12 = int_to_ptr.vmem [resolvable:$false] %s539_s12 }
  0x2d   : > { %p537_p9 = pnand %p536_p6, %p671_p5  ;;  %s541_s19 = scalar_lea.vmem %s540_s12, 128 }
  0x2e   : > { %440 = vmatpush3.bf16.msra.mxu0 %v505_v5  ;;  %p542_p11 = scmp.lt.s32.totalorder %s340_s5, %s540_s12  ;;  %p543_p12 = scmp.lt.s32.totalorder %s541_s19, %s535_s10 }
  0x2f   : > { %441 = vmatprep.subr.bf16.mxu0 %v605_v1  ;;  %p538_p10 = pneg %p537_p9 }
  0x30   : > { %p544_p13 = por %p543_p12, %p542_p11 }
  0x32   : > { %442 = vmatpush3.bf16.msra.mxu0 %v506_v6  ;;  %p545_p0 = pnand %p544_p13, %p538_p10 }
  0xa6   : > { %v214_v9 = vpop.permute.xlu0 %213 }
  0xa7   : > { %vm215_vm1 = vcmp.eq.s32.totalorder %v214_v9, %v211_v8 }
  0xa8   : > { %v418_v10 = vsel %vm215_vm1, 1.0, %v605_v1 }
  0xa9   : > { %v218_v11 = vpack.c.bf16 %v418_v10, %v418_v10 }
  0xab   : > { %444 = vmatmul.mubr.msk.bf16.vlgmr.msra.gmra.mxu0 %vm251_vm2, %v218_v11 }
 0x16b   : > { %v289_v12 = vpop.f32.mrf.mxu0 }
 0x16c   : > { %295 = vadd.xlane.f32.xlu0 %v289_v12 }
 0x16d   : > { %v445_v13 = vpop.f32.mrf.mxu0 }
 0x16f   : > { %v292_v14 = vpop.f32.mrf.mxu0 }
 0x171   : > { %v446_v15 = vpop.f32.mrf.mxu0 }
 0x1f5   : > { %v296_v16 = vpop.xlane.xlu0 %295 }
 0x1f6   : > { %v298_v17 = vmul.f32 0.0078125, %v296_v16 }
 0x1f8   : > { %v299_v18 = vsub.f32 %v289_v12, %v298_v17 }
 0x1fa   : > { %v300_v19 = vmul.f32 %v299_v18, %v299_v18 }
 0x1fc   : > { %301 = vadd.xlane.f32.xlu1 %v300_v19 }
 0x285   : > { %v302_v20 = vpop.xlane.xlu1 %301 }
 0x286   : > { %v303_v21 = vmul.f32 0.0078125, %v302_v20 }
 0x288   : > { %v304_v22 = vadd.f32 1e-05, %v303_v21 }
 0x28a   : > { %507 = vrsqrt.f32 %v304_v22 }
 0x297   : > { %v508_v23 = vpop.eup %507 }
 0x298   : > { %v306_v25 = vmul.f32 %v508_v23, %v299_v18 }
 0x29a   : > { %v314_v27 = vmul.f32 %v424_v24, %v306_v25 }
 0x29c   : > { %v322_v28 = vadd.f32 %v425_v26, %v314_v27 }
 0x29e   : > { %v323_v29 = vpack.c.bf16 %v322_v28, %v322_v28 }
 0x2a0   : > { %324 = vst [vmem:[%s203_s30] sm:$0xf] %v323_v29 }
 0x2a1   : > { %548 = shalt.err (!%p545_p0)
}
 0x2a2   : > { %s549_s13 = scalar_lea.hbm %s337_s8, 64  ;;  %s553_s22 = scalar_lea.hbm %s748_s4, 128 }
 0x2a3   : > { %p550_p1 = scmp.ne.s32.totalorder %s337_s8, %s549_s13  ;;  %p554_p4 = scmp.lt.s32.totalorder %s337_s8, %s748_s4 }
 0x2a4   : > { %p555_p7 = scmp.lt.s32.totalorder %s553_s22, %s549_s13 }
 0x2a5   : > { %p551_p2 = pnand %p550_p1, %p671_p5 }
 0x2a6   : > { %p556_p8 = por %p555_p7, %p554_p4 }
 0x2a7   : > { %p552_p3 = pneg %p551_p2 }
 0x2a9   : > { %p557_p6 = pnand %p556_p8, %p552_p3 }
 0x2ab   : > { %560 = shalt.err (!%p557_p6)
}
 0x2ac   : > { %451 = dma.vmem_to_hbm [thread:$0]  (%p671_p5), %s340_s5, 64, %s337_s8, %s326_s9  }
 0x2ad PF: > { %p463_p9 = scmp.ge.s32.totalorder %s599_s18, 2  ;;  %s351_s28 = sand.u32 1, %s587_s15  }
 0x2ae   : > { %p752_p10 = scmp.ne.s32.totalorder %s750_s26, 0  ;;  %s352_s29 = scalar_lea.sflag [#allocation4], %s351_s28 }
 0x2b0   : > { %p458_p11 = pnand %p463_p9, %p752_p10 }
 0x2b2   : > { %p459_p12 = pneg %p458_p11 }
 0x2b4   : > { %582 = dma.done.wait (%p459_p12), %s352_s29, 64  }
 0x2b5   : > { %584 = vsyncadd (%p459_p12), %s352_s29, 4294967232  ;;  %p15_p13 = scmp.ge.s32.totalorder %s658_s21, 4   ;;  %s753_s15 = smov %s591_s16 }
 0x2b6   : > { %s754_s16 = smov %s595_s17  ;;  %s755_s17 = smov %s669_s24 }
 0x2b7   : > { %s756_s18 = smov %s658_s21  ;;  %17 = sbr.rel (!%p15_p13) target bundleno = 4 (0x4), region = 76 }
 0x2bc   :  { %357 = vsyncpa [#allocation3], 1 }
 0x2bd   :  { %359 = vsyncpa [#allocation3 + $0x1], 1 }
 0x2be   :  { %360 = vsyncpa [#allocation4], 1 }
 0x2bf   :  { %362 = vsyncpa [#allocation4 + $0x1], 1 }

</bundles_post_ra>
